<compile_context>
chip_gen: v7x
topology: tpu7x:2x2x1
jax: 0.10.0
libtpu: 0.0.40
codegen_flags: <defaults>
</compile_context>

<pallas_src>
import functools

import jax
import jax.numpy as jnp
from jax.experimental import pallas as pl
from jax.experimental.pallas import tpu as pltpu

BN_EPS = 1e-5
LEAKY_SLOPE = 0.2

# ----------------------- packed-parameter layout -----------------------------
# weight slab layer order (row-packed along sublanes):
_L_E0, _L_E1, _L_E2, _L_E3, _L_ML, _L_D0, _L_D1, _L_D2, _L_D3, _L_D4 = range(10)
# vector slab rows (each (1, W) f32, zero padded):
_EB0, _EG0, _EBT0 = 0, 1, 2
_EB1, _EG1, _EBT1 = 3, 4, 5
_EB2, _EG2, _EBT2 = 6, 7, 8
_EB3, _EG3, _EBT3 = 9, 10, 11
_MLB = 12                      # [mean_bias | logvar_bias]
_DB0 = 13
_DB1, _DG1, _DBT1 = 14, 15, 16
_DB2, _DG2, _DBT2 = 17, 18, 19
_DB3, _DG3, _DBT3 = 20, 21, 22
_DB4 = 23
_N_VEC = 24


def _round_up(n, m):
    return ((n + m - 1) // m) * m


def _layout(nz, ndf, n_cond):
    """Static packing layout derived from the module hyper-parameters."""
    n_rec = ndf - n_cond
    off_out = _round_up(n_rec, 8)          # mean|logvar lane offset in output slab
    off_eps = _round_up(ndf, 16)           # eps lane offset in input slab
    W = _round_up(max(nz * 16, off_eps + nz, off_out + 2 * nz), 128)
    # per-layer contraction sizes (unpadded K); N is always padded to W.
    ks = [ndf,            # E0: [x | cond]
          16 * nz, 8 * nz, 4 * nz,         # E1..E3
          2 * nz,                          # fused mean|logvar head
          nz + n_cond,                     # D0: [z | cond]
          2 * nz, 4 * nz, 8 * nz, 16 * nz]  # D1..D4
    offsets, r = [], 0
    for k in ks:
        kp = _round_up(k, 16)              # bf16 sublane-tile aligned
        offsets.append((r, kp))
        r += kp
    return dict(n_rec=n_rec, off_out=off_out, off_eps=off_eps, W=W,
                offsets=tuple(offsets), total_rows=_round_up(r, 16))


# --------------------------------- kernel ------------------------------------
def vae_kernel(inp_ref, w_ref, vec_ref, out_ref, *,
               nz, n_cond, n_rec, off_eps, off_out, offsets):
    inp = inp_ref[...]                      # (B, W) f32:  x | cond | 0 | eps | 0
    B = inp.shape[0]

    def vrow(i):                            # (1, W) packed parameter row
        return vec_ref[i:i + 1, :]

    def leaky(h):
        return jnp.where(h > 0, h, LEAKY_SLOPE * h)

    def bn(h, gi, bi):
        # training-mode BatchNorm1d (biased batch variance); padded lanes stay 0.
        mu = jnp.mean(h, axis=0, keepdims=True)
        c = h - mu
        var = jnp.mean(c * c, axis=0, keepdims=True)
        return c * jax.lax.rsqrt(var + BN_EPS) * vrow(gi) + vrow(bi)

    def mm(h, li):
        # bf16 MXU matmul against a static, 16-aligned row slice of the slab.
        off, kp = offsets[li]
        lhs = h[:, :kp].astype(jnp.bfloat16)
        return jnp.dot(lhs, w_ref[off:off + kp, :],
                       preferred_element_type=jnp.float32)

    # ------------------------------- encoder ---------------------------------
    # cond columns are folded into W_E0 rows (cond sits in lanes [n_rec:ndf]).
    h = mm(inp, _L_E0) + vrow(_EB0)
    h = bn(leaky(h), _EG0, _EBT0)
    h = bn(leaky(mm(h, _L_E1) + vrow(_EB1)), _EG1, _EBT1)
    h = bn(leaky(mm(h, _L_E2) + vrow(_EB2)), _EG2, _EBT2)
    h = bn(leaky(mm(h, _L_E3) + vrow(_EB3)), _EG3, _EBT3)

    # fused mean|logvar head: lanes [0:nz]=mean, [nz:2nz]=logvar, rest zero.
    ml = mm(h, _L_ML) + vrow(_MLB)
    mean = ml[:, 0:nz]
    logvar = ml[:, nz:2 * nz]

    # reparametrize: z = mean + eps * exp(0.5 * logvar)   (f32 EUP exp)
    eps = inp[:, off_eps:off_eps + nz]
    z = mean + eps * jnp.exp(0.5 * logvar)

    # ------------------------------- decoder ---------------------------------
    cond = inp[:, n_rec:n_rec + n_cond]
    kd0 = offsets[_L_D0][1]
    pieces = [z, cond]
    pad = kd0 - nz - n_cond
    if pad > 0:
        pieces.append(jnp.zeros((B, pad), jnp.float32))
    zc = jnp.concatenate(pieces, axis=1)    # (B, kd0) = [z | cond | 0]

    d = mm(zc, _L_D0) + vrow(_DB0)
    d = jnp.maximum(d, 0.0)                 # nn.ReLU(True)
    d = bn(leaky(mm(d, _L_D1) + vrow(_DB1)), _DG1, _DBT1)
    d = bn(leaky(mm(d, _L_D2) + vrow(_DB2)), _DG2, _DBT2)
    d = bn(leaky(mm(d, _L_D3) + vrow(_DB3)), _DG3, _DBT3)
    rec = mm(d, _L_D4) + vrow(_DB4)         # lanes [n_rec:W] are exactly zero

    # assemble rec | mean | logvar in registers, single unmasked 128-lane store
    out_ref[...] = (rec + pltpu.roll(ml, off_out, axis=1)).astype(out_ref.dtype)


# ------------------------------- parameters ----------------------------------
def _init_linear(key, fan_in, fan_out):
    k1, k2 = jax.random.split(key)
    bound = 1.0 / float(fan_in) ** 0.5
    w = jax.random.uniform(k1, (fan_in, fan_out), jnp.float32, -bound, bound)
    b = jax.random.uniform(k2, (1, fan_out), jnp.float32, -bound, bound)
    return w, b


def _init_bn(n):
    return jnp.ones((1, n), jnp.float32), jnp.zeros((1, n), jnp.float32)


def init_vae_params(key, ndf, nz, n_cond):
    ks = iter(jax.random.split(key, 16))
    p = {}
    # encoder: ndf -> 16nz -> 8nz -> 4nz -> 2nz ; heads 2nz -> nz
    w0, p["eb0"] = _init_linear(next(ks), ndf, nz * 16)
    p["ew0x"], p["ew0c"] = w0[: ndf - n_cond], w0[ndf - n_cond:]   # cat([x, cond])
    p["eg0"], p["ebt0"] = _init_bn(nz * 16)
    p["ew1"], p["eb1"] = _init_linear(next(ks), nz * 16, nz * 8)
    p["eg1"], p["ebt1"] = _init_bn(nz * 8)
    p["ew2"], p["eb2"] = _init_linear(next(ks), nz * 8, nz * 4)
    p["eg2"], p["ebt2"] = _init_bn(nz * 4)
    p["ew3"], p["eb3"] = _init_linear(next(ks), nz * 4, nz * 2)
    p["eg3"], p["ebt3"] = _init_bn(nz * 2)
    p["mw"], p["mb"] = _init_linear(next(ks), nz * 2, nz)
    p["lw"], p["lb"] = _init_linear(next(ks), nz * 2, nz)
    # decoder: nz+n_cond -> 2nz -> 4nz -> 8nz -> 16nz -> ndf-n_cond
    w0d, p["db0"] = _init_linear(next(ks), nz + n_cond, nz * 2)
    p["dw0z"], p["dw0c"] = w0d[:nz], w0d[nz:]                      # cat([z, cond])
    p["dw1"], p["db1"] = _init_linear(next(ks), nz * 2, nz * 4)
    p["dg1"], p["dbt1"] = _init_bn(nz * 4)
    p["dw2"], p["db2"] = _init_linear(next(ks), nz * 4, nz * 8)
    p["dg2"], p["dbt2"] = _init_bn(nz * 8)
    p["dw3"], p["db3"] = _init_linear(next(ks), nz * 8, nz * 16)
    p["dg3"], p["dbt3"] = _init_bn(nz * 16)
    p["dw4"], p["db4"] = _init_linear(next(ks), nz * 16, ndf - n_cond)
    return p


def pack_params(p, nz, ndf, n_cond):
    """Pack into one row-packed bf16 weight slab + one f32 vector slab (once)."""
    lay = _layout(nz, ndf, n_cond)
    W, offs, rows = lay["W"], lay["offsets"], lay["total_rows"]

    weights = [
        jnp.concatenate([p["ew0x"], p["ew0c"]], axis=0),   # E0 with cond rows folded
        p["ew1"], p["ew2"], p["ew3"],
        jnp.concatenate([p["mw"], p["lw"]], axis=1),       # fused mean|logvar head
        jnp.concatenate([p["dw0z"], p["dw0c"]], axis=0),   # D0 with cond rows folded
        p["dw1"], p["dw2"], p["dw3"], p["dw4"],
    ]
    slab = jnp.zeros((rows, W), jnp.float32)
    for (off, _), w in zip(offs, weights):
        slab = slab.at[off:off + w.shape[0], :w.shape[1]].set(w.astype(jnp.float32))
    w_slab = slab.astype(jnp.bfloat16)       # ~rows*W*2 bytes, keeps N-pad zeros

    def padv(v):
        v = jnp.asarray(v, jnp.float32).reshape(1, -1)
        return jnp.pad(v, ((0, 0), (0, W - v.shape[1])))

    vec_rows = [
        p["eb0"], p["eg0"], p["ebt0"],
        p["eb1"], p["eg1"], p["ebt1"],
        p["eb2"], p["eg2"], p["ebt2"],
        p["eb3"], p["eg3"], p["ebt3"],
        jnp.concatenate([p["mb"], p["lb"]], axis=1),
        p["db0"],
        p["db1"], p["dg1"], p["dbt1"],
        p["db2"], p["dg2"], p["dbt2"],
        p["db3"], p["dg3"], p["dbt3"],
        p["db4"],
    ]
    assert len(vec_rows) == _N_VEC
    vec = jnp.concatenate([padv(v) for v in vec_rows], axis=0)
    vec = jnp.pad(vec, ((0, _round_up(vec.shape[0], 8) - vec.shape[0]), (0, 0)))
    return w_slab, vec


# --------------------------------- wrapper ------------------------------------
@functools.partial(jax.jit, static_argnames=("nz", "n_cond", "ndf"))
def vae_forward(x, conditions, eps, w_slab, vec_slab, *, nz, n_cond, ndf):
    B = x.shape[0]
    lay = _layout(nz, ndf, n_cond)
    W, n_rec = lay["W"], lay["n_rec"]
    off_eps, off_out = lay["off_eps"], lay["off_out"]

    # single lane-dense input slab:  x | cond | 0 | eps | 0   (one DMA)
    pieces = [x.astype(jnp.float32), conditions.astype(jnp.float32)]
    if off_eps - ndf > 0:
        pieces.append(jnp.zeros((B, off_eps - ndf), jnp.float32))
    pieces.append(eps.astype(jnp.float32))
    if W - (off_eps + nz) > 0:
        pieces.append(jnp.zeros((B, W - (off_eps + nz)), jnp.float32))
    inp = jnp.concatenate(pieces, axis=1)

    kernel = functools.partial(
        vae_kernel, nz=nz, n_cond=n_cond, n_rec=n_rec,
        off_eps=off_eps, off_out=off_out, offsets=lay["offsets"])
    vmem = pl.BlockSpec(memory_space=pltpu.MemorySpace.VMEM)
    out = pl.pallas_call(
        kernel,
        out_shape=jax.ShapeDtypeStruct((B, W), jnp.float32),
        in_specs=[vmem, vmem, vmem],
        out_specs=vmem,
    )(inp, w_slab, vec_slab)

    rec = out[:, :n_rec]
    mean = out[:, off_out:off_out + nz]
    logvar = out[:, off_out + nz:off_out + 2 * nz]
    # VAE.forward also returns `conditions` unchanged (pure pass-through glue).
    return rec, mean, logvar, conditions


# ----------------------------- pure-JAX reference -----------------------------
def vae_reference(x, conditions, eps, p, matmul_dtype=jnp.float32):
    def mm(a, w):
        return jnp.dot(a.astype(matmul_dtype), w.astype(matmul_dtype),
                       preferred_element_type=jnp.float32)

    def leaky(h):
        return jnp.where(h > 0, h, LEAKY_SLOPE * h)

    def bn(h, g, b):
        mu = jnp.mean(h, axis=0, keepdims=True)
        c = h - mu
        var = jnp.mean(c * c, axis=0, keepdims=True)
        return c * jax.lax.rsqrt(var + BN_EPS) * g + b

    h = mm(x, p["ew0x"]) + mm(conditions, p["ew0c"]) + p["eb0"]
    h = bn(leaky(h), p["eg0"], p["ebt0"])
    h = bn(leaky(mm(h, p["ew1"]) + p["eb1"]), p["eg1"], p["ebt1"])
    h = bn(leaky(mm(h, p["ew2"]) + p["eb2"]), p["eg2"], p["ebt2"])
    h = bn(leaky(mm(h, p["ew3"]) + p["eb3"]), p["eg3"], p["ebt3"])
    mean = mm(h, p["mw"]) + p["mb"]
    logvar = mm(h, p["lw"]) + p["lb"]
    z = mean + eps * jnp.exp(0.5 * logvar)
    d = mm(z, p["dw0z"]) + mm(conditions, p["dw0c"]) + p["db0"]
    d = jnp.maximum(d, 0.0)
    d = bn(leaky(mm(d, p["dw1"]) + p["db1"]), p["dg1"], p["dbt1"])
    d = bn(leaky(mm(d, p["dw2"]) + p["db2"]), p["dg2"], p["dbt2"])
    d = bn(leaky(mm(d, p["dw3"]) + p["db3"]), p["dg3"], p["dbt3"])
    rec = mm(d, p["dw4"]) + p["db4"]
    return rec, mean, logvar, conditions


# ----------------------------------- main -------------------------------------
if __name__ == "__main__":
    B, ndf, nz, n_cond = 8, 32, 8, 1

    key = jax.random.PRNGKey(0)
    k_x, k_c, k_eps, k_p = jax.random.split(key, 4)

    x = jax.random.normal(k_x, (B, ndf - n_cond), jnp.float32)
    conditions = jax.random.normal(k_c, (B, n_cond), jnp.float32)
    eps = jax.random.normal(k_eps, (B, nz), jnp.float32)   # reparametrize noise
    params = init_vae_params(k_p, ndf, nz, n_cond)
    w_slab, vec_slab = pack_params(params, nz, ndf, n_cond)

    rec, mean, logvar, cond_out = vae_forward(
        x, conditions, eps, w_slab, vec_slab, nz=nz, n_cond=n_cond, ndf=ndf)
    jax.block_until_ready((rec, mean, logvar, cond_out))

    assert rec.shape == (B, ndf - n_cond)
    assert mean.shape == (B, nz) and logvar.shape == (B, nz)

    # tight check against a matched-precision (bf16-matmul) reference
    rec_b, mean_b, logvar_b, _ = vae_reference(
        x, conditions, eps, params, matmul_dtype=jnp.bfloat16)
    assert jnp.allclose(rec, rec_b, atol=5e-3, rtol=5e-3)
    assert jnp.allclose(mean, mean_b, atol=5e-3, rtol=5e-3)
    assert jnp.allclose(logvar, logvar_b, atol=5e-3, rtol=5e-3)

    # loose check against the full-f32 reference (bf16 MXU numerics trade-off)
    rec_r, mean_r, logvar_r, _ = vae_reference(x, conditions, eps, params)
    assert jnp.allclose(rec, rec_r, atol=5e-2, rtol=5e-2)
    assert jnp.allclose(mean, mean_r, atol=5e-2, rtol=5e-2)
    assert jnp.allclose(logvar, logvar_r, atol=5e-2, rtol=5e-2)
    assert jnp.array_equal(cond_out, conditions)

    print("KERNEL_OK")
</pallas_src>

<mosaic_0001>
module attributes {stable_mosaic.version = 11 : i64} {
  func.func @vae_kernel(%arg0: memref<8x128xf32, #tpu.memory_space<vmem>>, %arg1: memref<528x128xbf16, #tpu.memory_space<vmem>>, %arg2: memref<24x128xf32, #tpu.memory_space<vmem>>, %arg3: memref<8x128xf32, #tpu.memory_space<vmem>>) attributes {dimension_semantics = [], scalar_prefetch = 0 : i64, scratch_operands = 0 : i64, tpu.core_type = #tpu.core_type<tc>} {
    %c0 = arith.constant 0 : index
    %c0_0 = arith.constant 0 : index
    %0 = vector.load %arg0[%c0, %c0_0] : memref<8x128xf32, #tpu.memory_space<vmem>>, vector<8x128xf32>
    %1 = vector.extract_strided_slice %0 {offsets = [0, 0], sizes = [8, 32], strides = [1, 1]} : vector<8x128xf32> to vector<8x32xf32>
    %2 = arith.truncf %1 : vector<8x32xf32> to vector<8x32xbf16>
    %c0_1 = arith.constant 0 : index
    %c0_2 = arith.constant 0 : index
    %3 = vector.load %arg1[%c0_1, %c0_2] : memref<528x128xbf16, #tpu.memory_space<vmem>>, vector<32x128xbf16>
    %cst = arith.constant dense<0.000000e+00> : vector<8x128xf32>
    %4 = tpu.matmul %2, %3, %cst {dimension_numbers = #tpu.dot_dimension_numbers<[1], [0], [0], [1], [0, 0, 1, 1], [], []>} : vector<8x32xbf16>, vector<32x128xbf16>, vector<8x128xf32> -> vector<8x128xf32>
    %c0_3 = arith.constant 0 : index
    %c0_4 = arith.constant 0 : index
    %5 = vector.load %arg2[%c0_3, %c0_4] : memref<24x128xf32, #tpu.memory_space<vmem>>, vector<1x128xf32>
    %6 = vector.broadcast %5 : vector<1x128xf32> to vector<8x128xf32>
    %7 = arith.addf %4, %6 : vector<8x128xf32>
    %cst_5 = arith.constant 0.000000e+00 : f32
    %8 = vector.broadcast %cst_5 : f32 to vector<8x128xf32>
    %9 = arith.cmpf ogt, %7, %8 : vector<8x128xf32>
    %cst_6 = arith.constant 2.000000e-01 : f32
    %10 = vector.broadcast %cst_6 : f32 to vector<8x128xf32>
    %11 = arith.mulf %10, %7 : vector<8x128xf32>
    %12 = arith.select %9, %7, %11 : vector<8x128xi1>, vector<8x128xf32>
    %cst_7 = arith.constant dense<0.000000e+00> : vector<128xf32>
    %13 = vector.multi_reduction <add>, %12, %cst_7 [0] : vector<8x128xf32> to vector<128xf32>
    %14 = vector.shape_cast %13 : vector<128xf32> to vector<1x128xf32>
    %cst_8 = arith.constant 8.000000e+00 : f32
    %15 = vector.broadcast %cst_8 : f32 to vector<1x128xf32>
    %16 = arith.divf %14, %15 : vector<1x128xf32>
    %17 = vector.broadcast %16 : vector<1x128xf32> to vector<8x128xf32>
    %18 = arith.subf %12, %17 : vector<8x128xf32>
    %19 = arith.mulf %18, %18 : vector<8x128xf32>
    %cst_9 = arith.constant dense<0.000000e+00> : vector<128xf32>
    %20 = vector.multi_reduction <add>, %19, %cst_9 [0] : vector<8x128xf32> to vector<128xf32>
    %21 = vector.shape_cast %20 : vector<128xf32> to vector<1x128xf32>
    %cst_10 = arith.constant 8.000000e+00 : f32
    %22 = vector.broadcast %cst_10 : f32 to vector<1x128xf32>
    %23 = arith.divf %21, %22 : vector<1x128xf32>
    %cst_11 = arith.constant 9.99999974E-6 : f32
    %24 = vector.broadcast %cst_11 : f32 to vector<1x128xf32>
    %25 = arith.addf %23, %24 : vector<1x128xf32>
    %26 = math.rsqrt %25 : vector<1x128xf32>
    %27 = vector.broadcast %26 : vector<1x128xf32> to vector<8x128xf32>
    %28 = arith.mulf %18, %27 : vector<8x128xf32>
    %c1 = arith.constant 1 : index
    %c0_12 = arith.constant 0 : index
    %29 = vector.load %arg2[%c1, %c0_12] : memref<24x128xf32, #tpu.memory_space<vmem>>, vector<1x128xf32>
    %30 = vector.broadcast %29 : vector<1x128xf32> to vector<8x128xf32>
    %31 = arith.mulf %28, %30 : vector<8x128xf32>
    %c2 = arith.constant 2 : index
    %c0_13 = arith.constant 0 : index
    %32 = vector.load %arg2[%c2, %c0_13] : memref<24x128xf32, #tpu.memory_space<vmem>>, vector<1x128xf32>
    %33 = vector.broadcast %32 : vector<1x128xf32> to vector<8x128xf32>
    %34 = arith.addf %31, %33 : vector<8x128xf32>
    %35 = arith.truncf %34 : vector<8x128xf32> to vector<8x128xbf16>
    %c32 = arith.constant 32 : index
    %c0_14 = arith.constant 0 : index
    %36 = vector.load %arg1[%c32, %c0_14] : memref<528x128xbf16, #tpu.memory_space<vmem>>, vector<128x128xbf16>
    %cst_15 = arith.constant dense<0.000000e+00> : vector<8x128xf32>
    %37 = tpu.matmul %35, %36, %cst_15 {dimension_numbers = #tpu.dot_dimension_numbers<[1], [0], [0], [1], [0, 0, 1, 1], [], []>} : vector<8x128xbf16>, vector<128x128xbf16>, vector<8x128xf32> -> vector<8x128xf32>
    %c3 = arith.constant 3 : index
    %c0_16 = arith.constant 0 : index
    %38 = vector.load %arg2[%c3, %c0_16] : memref<24x128xf32, #tpu.memory_space<vmem>>, vector<1x128xf32>
    %39 = vector.broadcast %38 : vector<1x128xf32> to vector<8x128xf32>
    %40 = arith.addf %37, %39 : vector<8x128xf32>
    %cst_17 = arith.constant 0.000000e+00 : f32
    %41 = vector.broadcast %cst_17 : f32 to vector<8x128xf32>
    %42 = arith.cmpf ogt, %40, %41 : vector<8x128xf32>
    %cst_18 = arith.constant 2.000000e-01 : f32
    %43 = vector.broadcast %cst_18 : f32 to vector<8x128xf32>
    %44 = arith.mulf %43, %40 : vector<8x128xf32>
    %45 = arith.select %42, %40, %44 : vector<8x128xi1>, vector<8x128xf32>
    %cst_19 = arith.constant dense<0.000000e+00> : vector<128xf32>
    %46 = vector.multi_reduction <add>, %45, %cst_19 [0] : vector<8x128xf32> to vector<128xf32>
    %47 = vector.shape_cast %46 : vector<128xf32> to vector<1x128xf32>
    %cst_20 = arith.constant 8.000000e+00 : f32
    %48 = vector.broadcast %cst_20 : f32 to vector<1x128xf32>
    %49 = arith.divf %47, %48 : vector<1x128xf32>
    %50 = vector.broadcast %49 : vector<1x128xf32> to vector<8x128xf32>
    %51 = arith.subf %45, %50 : vector<8x128xf32>
    %52 = arith.mulf %51, %51 : vector<8x128xf32>
    %cst_21 = arith.constant dense<0.000000e+00> : vector<128xf32>
    %53 = vector.multi_reduction <add>, %52, %cst_21 [0] : vector<8x128xf32> to vector<128xf32>
    %54 = vector.shape_cast %53 : vector<128xf32> to vector<1x128xf32>
    %cst_22 = arith.constant 8.000000e+00 : f32
    %55 = vector.broadcast %cst_22 : f32 to vector<1x128xf32>
    %56 = arith.divf %54, %55 : vector<1x128xf32>
    %cst_23 = arith.constant 9.99999974E-6 : f32
    %57 = vector.broadcast %cst_23 : f32 to vector<1x128xf32>
    %58 = arith.addf %56, %57 : vector<1x128xf32>
    %59 = math.rsqrt %58 : vector<1x128xf32>
    %60 = vector.broadcast %59 : vector<1x128xf32> to vector<8x128xf32>
    %61 = arith.mulf %51, %60 : vector<8x128xf32>
    %c4 = arith.constant 4 : index
    %c0_24 = arith.constant 0 : index
    %62 = vector.load %arg2[%c4, %c0_24] : memref<24x128xf32, #tpu.memory_space<vmem>>, vector<1x128xf32>
    %63 = vector.broadcast %62 : vector<1x128xf32> to vector<8x128xf32>
    %64 = arith.mulf %61, %63 : vector<8x128xf32>
    %c5 = arith.constant 5 : index
    %c0_25 = arith.constant 0 : index
    %65 = vector.load %arg2[%c5, %c0_25] : memref<24x128xf32, #tpu.memory_space<vmem>>, vector<1x128xf32>
    %66 = vector.broadcast %65 : vector<1x128xf32> to vector<8x128xf32>
    %67 = arith.addf %64, %66 : vector<8x128xf32>
    %68 = vector.extract_strided_slice %67 {offsets = [0, 0], sizes = [8, 64], strides = [1, 1]} : vector<8x128xf32> to vector<8x64xf32>
    %69 = arith.truncf %68 : vector<8x64xf32> to vector<8x64xbf16>
    %c160 = arith.constant 160 : index
    %c0_26 = arith.constant 0 : index
    %70 = vector.load %arg1[%c160, %c0_26] : memref<528x128xbf16, #tpu.memory_space<vmem>>, vector<64x128xbf16>
    %cst_27 = arith.constant dense<0.000000e+00> : vector<8x128xf32>
    %71 = tpu.matmul %69, %70, %cst_27 {dimension_numbers = #tpu.dot_dimension_numbers<[1], [0], [0], [1], [0, 0, 1, 1], [], []>} : vector<8x64xbf16>, vector<64x128xbf16>, vector<8x128xf32> -> vector<8x128xf32>
    %c6 = arith.constant 6 : index
    %c0_28 = arith.constant 0 : index
    %72 = vector.load %arg2[%c6, %c0_28] : memref<24x128xf32, #tpu.memory_space<vmem>>, vector<1x128xf32>
    %73 = vector.broadcast %72 : vector<1x128xf32> to vector<8x128xf32>
    %74 = arith.addf %71, %73 : vector<8x128xf32>
    %cst_29 = arith.constant 0.000000e+00 : f32
    %75 = vector.broadcast %cst_29 : f32 to vector<8x128xf32>
    %76 = arith.cmpf ogt, %74, %75 : vector<8x128xf32>
    %cst_30 = arith.constant 2.000000e-01 : f32
    %77 = vector.broadcast %cst_30 : f32 to vector<8x128xf32>
    %78 = arith.mulf %77, %74 : vector<8x128xf32>
    %79 = arith.select %76, %74, %78 : vector<8x128xi1>, vector<8x128xf32>
    %cst_31 = arith.constant dense<0.000000e+00> : vector<128xf32>
    %80 = vector.multi_reduction <add>, %79, %cst_31 [0] : vector<8x128xf32> to vector<128xf32>
    %81 = vector.shape_cast %80 : vector<128xf32> to vector<1x128xf32>
    %cst_32 = arith.constant 8.000000e+00 : f32
    %82 = vector.broadcast %cst_32 : f32 to vector<1x128xf32>
    %83 = arith.divf %81, %82 : vector<1x128xf32>
    %84 = vector.broadcast %83 : vector<1x128xf32> to vector<8x128xf32>
    %85 = arith.subf %79, %84 : vector<8x128xf32>
    %86 = arith.mulf %85, %85 : vector<8x128xf32>
    %cst_33 = arith.constant dense<0.000000e+00> : vector<128xf32>
    %87 = vector.multi_reduction <add>, %86, %cst_33 [0] : vector<8x128xf32> to vector<128xf32>
    %88 = vector.shape_cast %87 : vector<128xf32> to vector<1x128xf32>
    %cst_34 = arith.constant 8.000000e+00 : f32
    %89 = vector.broadcast %cst_34 : f32 to vector<1x128xf32>
    %90 = arith.divf %88, %89 : vector<1x128xf32>
    %cst_35 = arith.constant 9.99999974E-6 : f32
    %91 = vector.broadcast %cst_35 : f32 to vector<1x128xf32>
    %92 = arith.addf %90, %91 : vector<1x128xf32>
    %93 = math.rsqrt %92 : vector<1x128xf32>
    %94 = vector.broadcast %93 : vector<1x128xf32> to vector<8x128xf32>
    %95 = arith.mulf %85, %94 : vector<8x128xf32>
    %c7 = arith.constant 7 : index
    %c0_36 = arith.constant 0 : index
    %96 = vector.load %arg2[%c7, %c0_36] : memref<24x128xf32, #tpu.memory_space<vmem>>, vector<1x128xf32>
    %97 = vector.broadcast %96 : vector<1x128xf32> to vector<8x128xf32>
    %98 = arith.mulf %95, %97 : vector<8x128xf32>
    %c8 = arith.constant 8 : index
    %c0_37 = arith.constant 0 : index
    %99 = vector.load %arg2[%c8, %c0_37] : memref<24x128xf32, #tpu.memory_space<vmem>>, vector<1x128xf32>
    %100 = vector.broadcast %99 : vector<1x128xf32> to vector<8x128xf32>
    %101 = arith.addf %98, %100 : vector<8x128xf32>
    %102 = vector.extract_strided_slice %101 {offsets = [0, 0], sizes = [8, 32], strides = [1, 1]} : vector<8x128xf32> to vector<8x32xf32>
    %103 = arith.truncf %102 : vector<8x32xf32> to vector<8x32xbf16>
    %c224 = arith.constant 224 : index
    %c0_38 = arith.constant 0 : index
    %104 = vector.load %arg1[%c224, %c0_38] : memref<528x128xbf16, #tpu.memory_space<vmem>>, vector<32x128xbf16>
    %cst_39 = arith.constant dense<0.000000e+00> : vector<8x128xf32>
    %105 = tpu.matmul %103, %104, %cst_39 {dimension_numbers = #tpu.dot_dimension_numbers<[1], [0], [0], [1], [0, 0, 1, 1], [], []>} : vector<8x32xbf16>, vector<32x128xbf16>, vector<8x128xf32> -> vector<8x128xf32>
    %c9 = arith.constant 9 : index
    %c0_40 = arith.constant 0 : index
    %106 = vector.load %arg2[%c9, %c0_40] : memref<24x128xf32, #tpu.memory_space<vmem>>, vector<1x128xf32>
    %107 = vector.broadcast %106 : vector<1x128xf32> to vector<8x128xf32>
    %108 = arith.addf %105, %107 : vector<8x128xf32>
    %cst_41 = arith.constant 0.000000e+00 : f32
    %109 = vector.broadcast %cst_41 : f32 to vector<8x128xf32>
    %110 = arith.cmpf ogt, %108, %109 : vector<8x128xf32>
    %cst_42 = arith.constant 2.000000e-01 : f32
    %111 = vector.broadcast %cst_42 : f32 to vector<8x128xf32>
    %112 = arith.mulf %111, %108 : vector<8x128xf32>
    %113 = arith.select %110, %108, %112 : vector<8x128xi1>, vector<8x128xf32>
    %cst_43 = arith.constant dense<0.000000e+00> : vector<128xf32>
    %114 = vector.multi_reduction <add>, %113, %cst_43 [0] : vector<8x128xf32> to vector<128xf32>
    %115 = vector.shape_cast %114 : vector<128xf32> to vector<1x128xf32>
    %cst_44 = arith.constant 8.000000e+00 : f32
    %116 = vector.broadcast %cst_44 : f32 to vector<1x128xf32>
    %117 = arith.divf %115, %116 : vector<1x128xf32>
    %118 = vector.broadcast %117 : vector<1x128xf32> to vector<8x128xf32>
    %119 = arith.subf %113, %118 : vector<8x128xf32>
    %120 = arith.mulf %119, %119 : vector<8x128xf32>
    %cst_45 = arith.constant dense<0.000000e+00> : vector<128xf32>
    %121 = vector.multi_reduction <add>, %120, %cst_45 [0] : vector<8x128xf32> to vector<128xf32>
    %122 = vector.shape_cast %121 : vector<128xf32> to vector<1x128xf32>
    %cst_46 = arith.constant 8.000000e+00 : f32
    %123 = vector.broadcast %cst_46 : f32 to vector<1x128xf32>
    %124 = arith.divf %122, %123 : vector<1x128xf32>
    %cst_47 = arith.constant 9.99999974E-6 : f32
    %125 = vector.broadcast %cst_47 : f32 to vector<1x128xf32>
    %126 = arith.addf %124, %125 : vector<1x128xf32>
    %127 = math.rsqrt %126 : vector<1x128xf32>
    %128 = vector.broadcast %127 : vector<1x128xf32> to vector<8x128xf32>
    %129 = arith.mulf %119, %128 : vector<8x128xf32>
    %c10 = arith.constant 10 : index
    %c0_48 = arith.constant 0 : index
    %130 = vector.load %arg2[%c10, %c0_48] : memref<24x128xf32, #tpu.memory_space<vmem>>, vector<1x128xf32>
    %131 = vector.broadcast %130 : vector<1x128xf32> to vector<8x128xf32>
    %132 = arith.mulf %129, %131 : vector<8x128xf32>
    %c11 = arith.constant 11 : index
    %c0_49 = arith.constant 0 : index
    %133 = vector.load %arg2[%c11, %c0_49] : memref<24x128xf32, #tpu.memory_space<vmem>>, vector<1x128xf32>
    %134 = vector.broadcast %133 : vector<1x128xf32> to vector<8x128xf32>
    %135 = arith.addf %132, %134 : vector<8x128xf32>
    %136 = vector.extract_strided_slice %135 {offsets = [0, 0], sizes = [8, 16], strides = [1, 1]} : vector<8x128xf32> to vector<8x16xf32>
    %137 = arith.truncf %136 : vector<8x16xf32> to vector<8x16xbf16>
    %c256 = arith.constant 256 : index
    %c0_50 = arith.constant 0 : index
    %138 = vector.load %arg1[%c256, %c0_50] : memref<528x128xbf16, #tpu.memory_space<vmem>>, vector<16x128xbf16>
    %cst_51 = arith.constant dense<0.000000e+00> : vector<8x128xf32>
    %139 = tpu.matmul %137, %138, %cst_51 {dimension_numbers = #tpu.dot_dimension_numbers<[1], [0], [0], [1], [0, 0, 1, 1], [], []>} : vector<8x16xbf16>, vector<16x128xbf16>, vector<8x128xf32> -> vector<8x128xf32>
    %c12 = arith.constant 12 : index
    %c0_52 = arith.constant 0 : index
    %140 = vector.load %arg2[%c12, %c0_52] : memref<24x128xf32, #tpu.memory_space<vmem>>, vector<1x128xf32>
    %141 = vector.broadcast %140 : vector<1x128xf32> to vector<8x128xf32>
    %142 = arith.addf %139, %141 : vector<8x128xf32>
    %143 = vector.extract_strided_slice %142 {offsets = [0, 0], sizes = [8, 8], strides = [1, 1]} : vector<8x128xf32> to vector<8x8xf32>
    %144 = vector.extract_strided_slice %142 {offsets = [0, 8], sizes = [8, 8], strides = [1, 1]} : vector<8x128xf32> to vector<8x8xf32>
    %145 = vector.extract_strided_slice %0 {offsets = [0, 32], sizes = [8, 8], strides = [1, 1]} : vector<8x128xf32> to vector<8x8xf32>
    %cst_53 = arith.constant 5.000000e-01 : f32
    %146 = vector.broadcast %cst_53 : f32 to vector<8x8xf32>
    %147 = arith.mulf %146, %144 : vector<8x8xf32>
    %148 = math.exp %147 : vector<8x8xf32>
    %149 = arith.mulf %145, %148 : vector<8x8xf32>
    %150 = arith.addf %143, %149 : vector<8x8xf32>
    %151 = vector.extract_strided_slice %0 {offsets = [0, 31], sizes = [8, 1], strides = [1, 1]} : vector<8x128xf32> to vector<8x1xf32>
    %cst_54 = arith.constant 0.000000e+00 : f32
    %152 = vector.broadcast %cst_54 : f32 to vector<8x7xf32>
    %153 = tpu.concatenate %150, %151, %152 in 1 : vector<8x8xf32>, vector<8x1xf32>, vector<8x7xf32> -> vector<8x16xf32>
    %154 = arith.truncf %153 : vector<8x16xf32> to vector<8x16xbf16>
    %c272 = arith.constant 272 : index
    %c0_55 = arith.constant 0 : index
    %155 = vector.load %arg1[%c272, %c0_55] : memref<528x128xbf16, #tpu.memory_space<vmem>>, vector<16x128xbf16>
    %cst_56 = arith.constant dense<0.000000e+00> : vector<8x128xf32>
    %156 = tpu.matmul %154, %155, %cst_56 {dimension_numbers = #tpu.dot_dimension_numbers<[1], [0], [0], [1], [0, 0, 1, 1], [], []>} : vector<8x16xbf16>, vector<16x128xbf16>, vector<8x128xf32> -> vector<8x128xf32>
    %c13 = arith.constant 13 : index
    %c0_57 = arith.constant 0 : index
    %157 = vector.load %arg2[%c13, %c0_57] : memref<24x128xf32, #tpu.memory_space<vmem>>, vector<1x128xf32>
    %158 = vector.broadcast %157 : vector<1x128xf32> to vector<8x128xf32>
    %159 = arith.addf %156, %158 : vector<8x128xf32>
    %cst_58 = arith.constant 0.000000e+00 : f32
    %160 = vector.broadcast %cst_58 : f32 to vector<8x128xf32>
    %161 = arith.maximumf %159, %160 : vector<8x128xf32>
    %162 = vector.extract_strided_slice %161 {offsets = [0, 0], sizes = [8, 16], strides = [1, 1]} : vector<8x128xf32> to vector<8x16xf32>
    %163 = arith.truncf %162 : vector<8x16xf32> to vector<8x16xbf16>
    %c288 = arith.constant 288 : index
    %c0_59 = arith.constant 0 : index
    %164 = vector.load %arg1[%c288, %c0_59] : memref<528x128xbf16, #tpu.memory_space<vmem>>, vector<16x128xbf16>
    %cst_60 = arith.constant dense<0.000000e+00> : vector<8x128xf32>
    %165 = tpu.matmul %163, %164, %cst_60 {dimension_numbers = #tpu.dot_dimension_numbers<[1], [0], [0], [1], [0, 0, 1, 1], [], []>} : vector<8x16xbf16>, vector<16x128xbf16>, vector<8x128xf32> -> vector<8x128xf32>
    %c14 = arith.constant 14 : index
    %c0_61 = arith.constant 0 : index
    %166 = vector.load %arg2[%c14, %c0_61] : memref<24x128xf32, #tpu.memory_space<vmem>>, vector<1x128xf32>
    %167 = vector.broadcast %166 : vector<1x128xf32> to vector<8x128xf32>
    %168 = arith.addf %165, %167 : vector<8x128xf32>
    %cst_62 = arith.constant 0.000000e+00 : f32
    %169 = vector.broadcast %cst_62 : f32 to vector<8x128xf32>
    %170 = arith.cmpf ogt, %168, %169 : vector<8x128xf32>
    %cst_63 = arith.constant 2.000000e-01 : f32
    %171 = vector.broadcast %cst_63 : f32 to vector<8x128xf32>
    %172 = arith.mulf %171, %168 : vector<8x128xf32>
    %173 = arith.select %170, %168, %172 : vector<8x128xi1>, vector<8x128xf32>
    %cst_64 = arith.constant dense<0.000000e+00> : vector<128xf32>
    %174 = vector.multi_reduction <add>, %173, %cst_64 [0] : vector<8x128xf32> to vector<128xf32>
    %175 = vector.shape_cast %174 : vector<128xf32> to vector<1x128xf32>
    %cst_65 = arith.constant 8.000000e+00 : f32
    %176 = vector.broadcast %cst_65 : f32 to vector<1x128xf32>
    %177 = arith.divf %175, %176 : vector<1x128xf32>
    %178 = vector.broadcast %177 : vector<1x128xf32> to vector<8x128xf32>
    %179 = arith.subf %173, %178 : vector<8x128xf32>
    %180 = arith.mulf %179, %179 : vector<8x128xf32>
    %cst_66 = arith.constant dense<0.000000e+00> : vector<128xf32>
    %181 = vector.multi_reduction <add>, %180, %cst_66 [0] : vector<8x128xf32> to vector<128xf32>
    %182 = vector.shape_cast %181 : vector<128xf32> to vector<1x128xf32>
    %cst_67 = arith.constant 8.000000e+00 : f32
    %183 = vector.broadcast %cst_67 : f32 to vector<1x128xf32>
    %184 = arith.divf %182, %183 : vector<1x128xf32>
    %cst_68 = arith.constant 9.99999974E-6 : f32
    %185 = vector.broadcast %cst_68 : f32 to vector<1x128xf32>
    %186 = arith.addf %184, %185 : vector<1x128xf32>
    %187 = math.rsqrt %186 : vector<1x128xf32>
    %188 = vector.broadcast %187 : vector<1x128xf32> to vector<8x128xf32>
    %189 = arith.mulf %179, %188 : vector<8x128xf32>
    %c15 = arith.constant 15 : index
    %c0_69 = arith.constant 0 : index
    %190 = vector.load %arg2[%c15, %c0_69] : memref<24x128xf32, #tpu.memory_space<vmem>>, vector<1x128xf32>
    %191 = vector.broadcast %190 : vector<1x128xf32> to vector<8x128xf32>
    %192 = arith.mulf %189, %191 : vector<8x128xf32>
    %c16 = arith.constant 16 : index
    %c0_70 = arith.constant 0 : index
    %193 = vector.load %arg2[%c16, %c0_70] : memref<24x128xf32, #tpu.memory_space<vmem>>, vector<1x128xf32>
    %194 = vector.broadcast %193 : vector<1x128xf32> to vector<8x128xf32>
    %195 = arith.addf %192, %194 : vector<8x128xf32>
    %196 = vector.extract_strided_slice %195 {offsets = [0, 0], sizes = [8, 32], strides = [1, 1]} : vector<8x128xf32> to vector<8x32xf32>
    %197 = arith.truncf %196 : vector<8x32xf32> to vector<8x32xbf16>
    %c304 = arith.constant 304 : index
    %c0_71 = arith.constant 0 : index
    %198 = vector.load %arg1[%c304, %c0_71] : memref<528x128xbf16, #tpu.memory_space<vmem>>, vector<32x128xbf16>
    %cst_72 = arith.constant dense<0.000000e+00> : vector<8x128xf32>
    %199 = tpu.matmul %197, %198, %cst_72 {dimension_numbers = #tpu.dot_dimension_numbers<[1], [0], [0], [1], [0, 0, 1, 1], [], []>} : vector<8x32xbf16>, vector<32x128xbf16>, vector<8x128xf32> -> vector<8x128xf32>
    %c17 = arith.constant 17 : index
    %c0_73 = arith.constant 0 : index
    %200 = vector.load %arg2[%c17, %c0_73] : memref<24x128xf32, #tpu.memory_space<vmem>>, vector<1x128xf32>
    %201 = vector.broadcast %200 : vector<1x128xf32> to vector<8x128xf32>
    %202 = arith.addf %199, %201 : vector<8x128xf32>
    %cst_74 = arith.constant 0.000000e+00 : f32
    %203 = vector.broadcast %cst_74 : f32 to vector<8x128xf32>
    %204 = arith.cmpf ogt, %202, %203 : vector<8x128xf32>
    %cst_75 = arith.constant 2.000000e-01 : f32
    %205 = vector.broadcast %cst_75 : f32 to vector<8x128xf32>
    %206 = arith.mulf %205, %202 : vector<8x128xf32>
    %207 = arith.select %204, %202, %206 : vector<8x128xi1>, vector<8x128xf32>
    %cst_76 = arith.constant dense<0.000000e+00> : vector<128xf32>
    %208 = vector.multi_reduction <add>, %207, %cst_76 [0] : vector<8x128xf32> to vector<128xf32>
    %209 = vector.shape_cast %208 : vector<128xf32> to vector<1x128xf32>
    %cst_77 = arith.constant 8.000000e+00 : f32
    %210 = vector.broadcast %cst_77 : f32 to vector<1x128xf32>
    %211 = arith.divf %209, %210 : vector<1x128xf32>
    %212 = vector.broadcast %211 : vector<1x128xf32> to vector<8x128xf32>
    %213 = arith.subf %207, %212 : vector<8x128xf32>
    %214 = arith.mulf %213, %213 : vector<8x128xf32>
    %cst_78 = arith.constant dense<0.000000e+00> : vector<128xf32>
    %215 = vector.multi_reduction <add>, %214, %cst_78 [0] : vector<8x128xf32> to vector<128xf32>
    %216 = vector.shape_cast %215 : vector<128xf32> to vector<1x128xf32>
    %cst_79 = arith.constant 8.000000e+00 : f32
    %217 = vector.broadcast %cst_79 : f32 to vector<1x128xf32>
    %218 = arith.divf %216, %217 : vector<1x128xf32>
    %cst_80 = arith.constant 9.99999974E-6 : f32
    %219 = vector.broadcast %cst_80 : f32 to vector<1x128xf32>
    %220 = arith.addf %218, %219 : vector<1x128xf32>
    %221 = math.rsqrt %220 : vector<1x128xf32>
    %222 = vector.broadcast %221 : vector<1x128xf32> to vector<8x128xf32>
    %223 = arith.mulf %213, %222 : vector<8x128xf32>
    %c18 = arith.constant 18 : index
    %c0_81 = arith.constant 0 : index
    %224 = vector.load %arg2[%c18, %c0_81] : memref<24x128xf32, #tpu.memory_space<vmem>>, vector<1x128xf32>
    %225 = vector.broadcast %224 : vector<1x128xf32> to vector<8x128xf32>
    %226 = arith.mulf %223, %225 : vector<8x128xf32>
    %c19 = arith.constant 19 : index
    %c0_82 = arith.constant 0 : index
    %227 = vector.load %arg2[%c19, %c0_82] : memref<24x128xf32, #tpu.memory_space<vmem>>, vector<1x128xf32>
    %228 = vector.broadcast %227 : vector<1x128xf32> to vector<8x128xf32>
    %229 = arith.addf %226, %228 : vector<8x128xf32>
    %230 = vector.extract_strided_slice %229 {offsets = [0, 0], sizes = [8, 64], strides = [1, 1]} : vector<8x128xf32> to vector<8x64xf32>
    %231 = arith.truncf %230 : vector<8x64xf32> to vector<8x64xbf16>
    %c336 = arith.constant 336 : index
    %c0_83 = arith.constant 0 : index
    %232 = vector.load %arg1[%c336, %c0_83] : memref<528x128xbf16, #tpu.memory_space<vmem>>, vector<64x128xbf16>
    %cst_84 = arith.constant dense<0.000000e+00> : vector<8x128xf32>
    %233 = tpu.matmul %231, %232, %cst_84 {dimension_numbers = #tpu.dot_dimension_numbers<[1], [0], [0], [1], [0, 0, 1, 1], [], []>} : vector<8x64xbf16>, vector<64x128xbf16>, vector<8x128xf32> -> vector<8x128xf32>
    %c20 = arith.constant 20 : index
    %c0_85 = arith.constant 0 : index
    %234 = vector.load %arg2[%c20, %c0_85] : memref<24x128xf32, #tpu.memory_space<vmem>>, vector<1x128xf32>
    %235 = vector.broadcast %234 : vector<1x128xf32> to vector<8x128xf32>
    %236 = arith.addf %233, %235 : vector<8x128xf32>
    %cst_86 = arith.constant 0.000000e+00 : f32
    %237 = vector.broadcast %cst_86 : f32 to vector<8x128xf32>
    %238 = arith.cmpf ogt, %236, %237 : vector<8x128xf32>
    %cst_87 = arith.constant 2.000000e-01 : f32
    %239 = vector.broadcast %cst_87 : f32 to vector<8x128xf32>
    %240 = arith.mulf %239, %236 : vector<8x128xf32>
    %241 = arith.select %238, %236, %240 : vector<8x128xi1>, vector<8x128xf32>
    %cst_88 = arith.constant dense<0.000000e+00> : vector<128xf32>
    %242 = vector.multi_reduction <add>, %241, %cst_88 [0] : vector<8x128xf32> to vector<128xf32>
    %243 = vector.shape_cast %242 : vector<128xf32> to vector<1x128xf32>
    %cst_89 = arith.constant 8.000000e+00 : f32
    %244 = vector.broadcast %cst_89 : f32 to vector<1x128xf32>
    %245 = arith.divf %243, %244 : vector<1x128xf32>
    %246 = vector.broadcast %245 : vector<1x128xf32> to vector<8x128xf32>
    %247 = arith.subf %241, %246 : vector<8x128xf32>
    %248 = arith.mulf %247, %247 : vector<8x128xf32>
    %cst_90 = arith.constant dense<0.000000e+00> : vector<128xf32>
    %249 = vector.multi_reduction <add>, %248, %cst_90 [0] : vector<8x128xf32> to vector<128xf32>
    %250 = vector.shape_cast %249 : vector<128xf32> to vector<1x128xf32>
    %cst_91 = arith.constant 8.000000e+00 : f32
    %251 = vector.broadcast %cst_91 : f32 to vector<1x128xf32>
    %252 = arith.divf %250, %251 : vector<1x128xf32>
    %cst_92 = arith.constant 9.99999974E-6 : f32
    %253 = vector.broadcast %cst_92 : f32 to vector<1x128xf32>
    %254 = arith.addf %252, %253 : vector<1x128xf32>
    %255 = math.rsqrt %254 : vector<1x128xf32>
    %256 = vector.broadcast %255 : vector<1x128xf32> to vector<8x128xf32>
    %257 = arith.mulf %247, %256 : vector<8x128xf32>
    %c21 = arith.constant 21 : index
    %c0_93 = arith.constant 0 : index
    %258 = vector.load %arg2[%c21, %c0_93] : memref<24x128xf32, #tpu.memory_space<vmem>>, vector<1x128xf32>
    %259 = vector.broadcast %258 : vector<1x128xf32> to vector<8x128xf32>
    %260 = arith.mulf %257, %259 : vector<8x128xf32>
    %c22 = arith.constant 22 : index
    %c0_94 = arith.constant 0 : index
    %261 = vector.load %arg2[%c22, %c0_94] : memref<24x128xf32, #tpu.memory_space<vmem>>, vector<1x128xf32>
    %262 = vector.broadcast %261 : vector<1x128xf32> to vector<8x128xf32>
    %263 = arith.addf %260, %262 : vector<8x128xf32>
    %264 = arith.truncf %263 : vector<8x128xf32> to vector<8x128xbf16>
    %c400 = arith.constant 400 : index
    %c0_95 = arith.constant 0 : index
    %265 = vector.load %arg1[%c400, %c0_95] : memref<528x128xbf16, #tpu.memory_space<vmem>>, vector<128x128xbf16>
    %cst_96 = arith.constant dense<0.000000e+00> : vector<8x128xf32>
    %266 = tpu.matmul %264, %265, %cst_96 {dimension_numbers = #tpu.dot_dimension_numbers<[1], [0], [0], [1], [0, 0, 1, 1], [], []>} : vector<8x128xbf16>, vector<128x128xbf16>, vector<8x128xf32> -> vector<8x128xf32>
    %c23 = arith.constant 23 : index
    %c0_97 = arith.constant 0 : index
    %267 = vector.load %arg2[%c23, %c0_97] : memref<24x128xf32, #tpu.memory_space<vmem>>, vector<1x128xf32>
    %268 = vector.broadcast %267 : vector<1x128xf32> to vector<8x128xf32>
    %269 = arith.addf %266, %268 : vector<8x128xf32>
    %c32_i32 = arith.constant 32 : i32
    %270 = tpu.dynamic_rotate %142 by %c32_i32 dim 1 : vector<8x128xf32>, i32 -> vector<8x128xf32>
    %271 = arith.addf %269, %270 : vector<8x128xf32>
    %c0_98 = arith.constant 0 : index
    %c0_99 = arith.constant 0 : index
    %272 = vector.load %arg3[%c0_98, %c0_99] : memref<8x128xf32, #tpu.memory_space<vmem>>, vector<8x128xf32>
    tpu.vector_store %arg3[%c0_98, %c0_99], %271 {strides = array<i32>} : memref<8x128xf32, #tpu.memory_space<vmem>>, vector<8x128xf32>,
    return
  }
}

</mosaic_0001>

<bundles_post_ra>
// kernel: vae_forward.1
= control target key start
LH: loop header
LB: loop body
LE: loop exit
PB: predicated region body
PF: predicated region fallthrough
CT: control target
= control target key end

     0   :  { %8 = vsyncpa [#allocation3], 0  ;;  %s1347_s12 = smov [#allocation2]   ;;  %s1533_s0 = inlined_call_operand.vmem [shape: f32[8,128], index: 0, kind: input, shape index: {}]   ;;  %s1534_s1 = inlined_call_operand.hbm [shape: bf16[528,128], index: 1, kind: input, shape index: {}]   ;;  %s1535_s2 = inlined_call_operand.vmem [shape: f32[24,128], index: 2, kind: input, shape index: {}]   ;;  %s1536_s3 = inlined_call_operand.vmem [shape: f32[8,128], index: 3, kind: output, shape index: {}]  }
   0x1   :  { %s16_s13 = sshll.u32 %s1347_s12, 4  ;;  %s1323_s16 = scalar_lea.hbm %s1534_s1, 4224  ;;  %s17_s13 = int_to_ptr.vmem [resolvable:$true] %s16_s13 }
   0x2   :  { %p1324_p0 = scmp.ne.s32.totalorder %s1534_s1, %s1323_s16  ;;  %p1327_p1 = scmp.lt.u32.totalorder %s1323_s16, %s1534_s1 }
   0x4   :  { %p1329_p2 = pnand %p1327_p1, %p1324_p0 }
   0x6   :  { %1332 = shalt.err (!%p1329_p2)
}
   0x7   :  { %s1333_s21 = scalar_lea.vmem %s17_s13, 4224  ;;  %p1338_p4 = scmp.lt.s32.totalorder %s17_s13, %s17_s13 }
   0x8   :  { %p1334_p3 = scmp.ne.s32.totalorder %s17_s13, %s1333_s21  ;;  %p1339_p5 = scmp.lt.s32.totalorder %s1333_s21, %s1333_s21 }
   0xa   :  { %p1340_p6 = por %p1339_p5, %p1338_p4 }
   0xc   :  { %p1341_p7 = pnand %p1340_p6, %p1334_p3 }
   0xe   :  { %1344 = shalt.err (!%p1341_p7)
}
   0xf   :  { %s1348_s22 = smov 64   ;;  %s1349_s23 = smov 4  }
  0x10   :  { %22 = dma.hbm_to_vmem [thread:$0]  %s1534_s1, 4224, %s17_s13, [#allocation3], %s1348_s22, %s1348_s22, %s1349_s23  }
  0x11   :  { %1345 = dma.done.wait [#allocation3], 4224  }
  0x12   :  { %1346 = vsyncadd [#allocation3], 4294963072  ;;  %v1350_v0 = vmov 0.0   ;;  %vm1351_vm0 = vmmov 0   ;;  %v1274_v1 = vld [vmem:[#allocation2] sm:$0xff]   ;;  %v1275_v2 = vld [vmem:[#allocation2 + $0x8] sm:$0xff]  }
  0x13   :  { %1159 = vmatprep.subr.bf16.mxu0 %v1350_v0  ;;  %1163 = vmatprep.mubr.msk.bf16.mxu0 %vm1351_vm0, %v1350_v0  ;;  %v1397_v3 = vld [vmem:[%s1533_s0] sm:$0xff]  ;;  %vm52_vm1 = vcmask 261120   ;;  %v1276_v5 = vld [vmem:[#allocation2 + $0x10] sm:$0xff]   ;;  %v1277_v6 = vld [vmem:[#allocation2 + $0x18] sm:$0xff]   ;;  %vm313_vm4 = vcmask 523264   ;;  %s1352_s17 = smov 105  }
  0x14   :  { %1167 = vmatprep.subr.bf16.mxu1 %v1350_v0  ;;  %1183 = vmatprep.mubr.msk.bf16.mxu1 %vm1351_vm0, %v1350_v0  ;;  %v30_v4 = vpack.c.bf16 %v1397_v3, %v1397_v3  ;;  %v1278_v7 = vld [vmem:[#allocation2 + $0x20] sm:$0xff]   ;;  %v1279_v8 = vld [vmem:[#allocation2 + $0x28] sm:$0xff]   ;;  %v1280_v9 = vld [vmem:[#allocation2 + $0x30] sm:$0xff]   ;;  %vm504_vm7 = vcmask 130048   ;;  %s1353_s26 = smov 32   ;;  %s1354_s27 = smov 24  }
  0x15   :  { %1160 = vmatpush3.bf16.msra.mxu0 %v1274_v1  ;;  %1168 = vmatpush3.bf16.msra.mxu1 %v1276_v5  ;;  %v1281_v10 = vld [vmem:[#allocation2 + $0x38] sm:$0xff]   ;;  %v1282_v11 = vld [vmem:[#allocation2 + $0x40] sm:$0xff]   ;;  %v1283_v12 = vld [vmem:[#allocation2 + $0x48] sm:$0xff]   ;;  %s1355_s0 = smov 96   ;;  %vm565_vm8 = vcmask 64512   ;;  %vm567_vm9 = vcmask 72704  }
  0x16   :  { %1161 = vmatprep.subr.bf16.mxu0 %v1350_v0  ;;  %1169 = vmatprep.subr.bf16.mxu1 %v1350_v0  ;;  %v1051_v13 = vld [vmem:[%s1535_s2] ss:$0 sm:$0xff]  ;;  %v1055_v39 = vld [vmem:[%s1535_s2 + $0x1] ss:$0 sm:$0xff]  ;;  %v1056_v41 = vld [vmem:[%s1535_s2 + $0x2] ss:$0 sm:$0xff] }
  0x17   :  { %v1284_v45 = vld [vmem:[#allocation2 + $0x50] sm:$0xff]   ;;  %v1285_v46 = vld [vmem:[#allocation2 + $0x58] sm:$0xff]   ;;  %v1286_v47 = vld [vmem:[#allocation2 + $0x60] sm:$0xff]   ;;  %562 = vrot.lane.b32.xlu1 %v1397_v3, %s1352_s17 }
  0x18   :  { %v1287_v48 = vld [vmem:[#allocation2 + $0x68] sm:$0xff]   ;;  %v1057_v49 = vld [vmem:[%s1535_s2 + $0x3] ss:$0 sm:$0xff] }
  0x19   :  { %1162 = vmatpush3.bf16.msra.mxu0 %v1275_v2  ;;  %1170 = vmatpush3.bf16.msra.mxu1 %v1277_v6 }
  0x1a   :  { %1187 = vmatprep.subr.bf16.mxu0 %v1350_v0  ;;  %1171 = vmatprep.subr.bf16.mxu1 %v1350_v0 }
  0x1c   :  { %1164 = vmatmul.mubr.msk.bf16.vlgmr.msra.gmra.mrb[0].mxu0 %vm52_vm1, %v30_v4 }
  0x1d   :  { %1195 = vmatprep.mubr.msk.bf16.mxu0 %vm1351_vm0, %v1350_v0  ;;  %1172 = vmatpush3.bf16.msra.mxu1 %v1278_v7 }
  0x1e   :  { %1173 = vmatprep.subr.bf16.mxu1 %v1350_v0  ;;  %1188 = vmatpush3.bf16.msra.mxu0 %v1284_v45 }
  0x1f   :  { %1189 = vmatprep.subr.bf16.mxu0 %v1350_v0 }
  0x21   :  { %1174 = vmatpush3.bf16.msra.mxu1 %v1279_v8 }
  0x22   :  { %1175 = vmatprep.subr.bf16.mxu1 %v1350_v0  ;;  %1190 = vmatpush3.bf16.msra.mxu0 %v1285_v46 }
  0x23   :  { %1191 = vmatprep.subr.bf16.mxu0 %v1350_v0 }
  0x25   :  { %1176 = vmatpush3.bf16.msra.mxu1 %v1280_v9 }
  0x26   :  { %1177 = vmatprep.subr.bf16.mxu1 %v1350_v0  ;;  %1192 = vmatpush3.bf16.msra.mxu0 %v1286_v47  ;;  %v1074_v47 = vld [vmem:[%s1535_s2 + $0x7] ss:$0 sm:$0xff] }
  0x27   :  { %1193 = vmatprep.subr.bf16.mxu0 %v1350_v0 }
  0x29   :  { %1178 = vmatpush3.bf16.msra.mxu1 %v1281_v10 }
  0x2a   :  { %1179 = vmatprep.subr.bf16.mxu1 %v1350_v0  ;;  %1194 = vmatpush3.bf16.msra.mxu0 %v1287_v48 }
  0x2b   :  { %1199 = vmatprep.subr.bf16.mxu0 %v1350_v0 }
  0x2d   :  { %1180 = vmatpush3.bf16.msra.mxu1 %v1282_v11 }
  0x2e   :  { %1181 = vmatprep.subr.bf16.mxu1 %v1350_v0 }
  0x31   :  { %1182 = vmatpush3.bf16.msra.mxu1 %v1283_v12 }
  0x32   :  { %1225 = vmatprep.subr.bf16.mxu1 %v1350_v0 }
  0xef   :  { %v90_v14 = vpop.f32.mrb[0].mxu0 }
  0xf0   :  { %v91_v15 = vadd.f32 %v1051_v13, %v90_v14  ;;  %v1165_v16 = vpop.f32.mrb[1].mxu0  ;;  %v1066_v13 = vld [vmem:[%s1535_s2 + $0x4] ss:$0 sm:$0xff] }
  0xf1   :  { %v93_v17 = vpop.f32.mrb[2].mxu0 }
  0xf2   :  { %vm96_vm2 = vcmp.gt.f32.partialorder %v91_v15, 0.0  ;;  %v97_v18 = vmul.f32 0.2, %v91_v15  ;;  %v1166_v19 = vpop.f32.mrb[3].mxu0 }
  0xf3   :  { %v1288_v19 = vld [vmem:[#allocation2 + $0x70] sm:$0xff]  }
  0xf4   :  { %v98_v20 = vsel %vm96_vm2, %v91_v15, %v97_v18  ;;  %v1067_v15 = vld [vmem:[%s1535_s2 + $0x5] ss:$0 sm:$0xff] }
  0xf5   :  { %v99_v21 = vrot.slane %v98_v20, 4 }
  0xf7   :  { %v100_v22 = vadd.f32 %v99_v21, %v98_v20  ;;  %v1068_v21 = vld [vmem:[%s1535_s2 + $0x6] ss:$0 sm:$0xff] }
  0xf9   :  { %v101_v23 = vrot.slane %v100_v22, 2 }
  0xfb   :  { %v102_v24 = vadd.f32 %v101_v23, %v100_v22 }
  0xfd   :  { %v103_v25 = vrot.slane %v102_v24, 1 }
  0xff   :  { %v104_v26 = vadd.f32 %v103_v25, %v102_v24 }
 0x101   :  { %v106_v27 = vmul.f32 0.125, %v104_v26 }
 0x103   :  { %v107_v28 = vsub.f32 %v98_v20, %v106_v27  ;;  %v1289_v20 = vld [vmem:[#allocation2 + $0x78] sm:$0xff]  }
 0x105   :  { %v108_v29 = vmul.f32 %v107_v28, %v107_v28 }
 0x107   :  { %v109_v30 = vrot.slane %v108_v29, 4 }
 0x109   :  { %v110_v31 = vadd.f32 %v109_v30, %v108_v29 }
 0x10b   :  { %v111_v32 = vrot.slane %v110_v31, 2 }
 0x10d   :  { %v112_v33 = vadd.f32 %v111_v32, %v110_v31 }
 0x10f   :  { %v113_v34 = vrot.slane %v112_v33, 1 }
 0x111   :  { %v114_v35 = vadd.f32 %v113_v34, %v112_v33 }
 0x113   :  { %v115_v36 = vmul.f32 0.125, %v114_v35 }
 0x115   :  { %v116_v37 = vadd.f32 1e-05, %v115_v36 }
 0x117   :  { %1307 = vrsqrt.f32 %v116_v37 }
 0x121   :  { %v1308_v38 = vpop.eup %1307 }
 0x122   :  { %v118_v40 = vmul.f32 %v1308_v38, %v107_v28 }
 0x124   :  { %v124_v42 = vmul.f32 %v1055_v39, %v118_v40 }
 0x126   :  { %v130_v43 = vadd.f32 %v1056_v41, %v124_v42 }
 0x128   :  { %v131_v44 = vpack.c.bf16 %v130_v43, %v130_v43 }
 0x12a   :  { %1184 = vmatmul.mubr.bf16.vlgmr.msra.gmra.mrb[0].mxu1 %v131_v44 }
 0x12b   :  { %1229 = vmatprep.mubr.msk.bf16.mxu1 %vm1351_vm0, %v1350_v0 }
 0x1fd   :  { %v235_v50 = vpop.f32.mrb[0].mxu1 }
 0x1fe   :  { %v236_v51 = vadd.f32 %v1057_v49, %v235_v50  ;;  %v1185_v52 = vpop.f32.mrb[1].mxu1  ;;  %v1075_v49 = vld [vmem:[%s1535_s2 + $0x8] ss:$0 sm:$0xff] }
 0x1ff   :  { %v238_v53 = vpop.f32.mrb[2].mxu1 }
 0x200   :  { %vm241_vm3 = vcmp.gt.f32.partialorder %v236_v51, 0.0  ;;  %v242_v54 = vmul.f32 0.2, %v236_v51  ;;  %v1186_v55 = vpop.f32.mrb[3].mxu1  ;;  %v1290_v53 = vld [vmem:[#allocation2 + $0x80] sm:$0xff]  }
 0x202   :  { %v243_v56 = vsel %vm241_vm3, %v236_v51, %v242_v54  ;;  %v1076_v54 = vld [vmem:[%s1535_s2 + $0x9] ss:$0 sm:$0xff] }
 0x203   :  { %v244_v57 = vrot.slane %v243_v56, 4 }
 0x205   :  { %v245_v58 = vadd.f32 %v244_v57, %v243_v56 }
 0x207   :  { %v246_v59 = vrot.slane %v245_v58, 2 }
 0x209   :  { %v247_v60 = vadd.f32 %v246_v59, %v245_v58 }
 0x20b   :  { %v248_v61 = vrot.slane %v247_v60, 1 }
 0x20d   :  { %v249_v62 = vadd.f32 %v248_v61, %v247_v60 }
 0x20f   :  { %v250_v63 = vmul.f32 0.125, %v249_v62 }
 0x211   :  { %v251_v1 = vsub.f32 %v243_v56, %v250_v63 }
 0x213   :  { %v252_v2 = vmul.f32 %v251_v1, %v251_v1 }
 0x215   :  { %v253_v4 = vrot.slane %v252_v2, 4 }
 0x217   :  { %v254_v5 = vadd.f32 %v253_v4, %v252_v2 }
 0x219   :  { %v255_v6 = vrot.slane %v254_v5, 2 }
 0x21b   :  { %v256_v7 = vadd.f32 %v255_v6, %v254_v5 }
 0x21d   :  { %v257_v8 = vrot.slane %v256_v7, 1 }
 0x21f   :  { %v258_v9 = vadd.f32 %v257_v8, %v256_v7 }
 0x221   :  { %v259_v10 = vmul.f32 0.125, %v258_v9 }
 0x223   :  { %v260_v11 = vadd.f32 1e-05, %v259_v10 }
 0x225   :  { %1309 = vrsqrt.f32 %v260_v11 }
 0x22f   :  { %v1310_v12 = vpop.eup %1309 }
 0x230   :  { %v262_v14 = vmul.f32 %v1310_v12, %v251_v1 }
 0x232   :  { %v268_v16 = vmul.f32 %v1066_v13, %v262_v14 }
 0x234   :  { %v274_v17 = vadd.f32 %v1067_v15, %v268_v16 }
 0x236   :  { %v275_v18 = vpack.c.bf16 %v274_v17, %v274_v17 }
 0x238   :  { %1196 = vmatmul.mubr.msk.bf16.vlgmr.msra.gmra.mrb[4].mxu0 %vm313_vm4, %v275_v18  ;;  %v1080_v18 = vld [vmem:[%s1535_s2 + $0xa] ss:$0 sm:$0xff] }
 0x239   :  { %1203 = vmatprep.mubr.msk.bf16.mxu0 %vm1351_vm0, %v1350_v0  ;;  %1200 = vmatpush3.bf16.msra.mxu0 %v1288_v19 }
 0x23a   :  { %1201 = vmatprep.subr.bf16.mxu0 %v1350_v0 }
 0x23d   :  { %1202 = vmatpush3.bf16.msra.mxu0 %v1289_v20  ;;  %v1081_v20 = vld [vmem:[%s1535_s2 + $0xb] ss:$0 sm:$0xff] }
 0x23e   :  { %1207 = vmatprep.subr.bf16.mxu0 %v1350_v0 }
 0x30b   :  { %v351_v22 = vpop.f32.mrb[4].mxu0 }
 0x30c   :  { %v352_v23 = vadd.f32 %v1068_v21, %v351_v22  ;;  %v1197_v24 = vpop.f32.mrb[5].mxu0 }
 0x30d   :  { %v354_v25 = vpop.f32.mrb[6].mxu0  ;;  %v1082_v24 = vld [vmem:[%s1535_s2 + $0xc] ss:$0 sm:$0xff] }
 0x30e   :  { %vm357_vm5 = vcmp.gt.f32.partialorder %v352_v23, 0.0  ;;  %v358_v26 = vmul.f32 0.2, %v352_v23  ;;  %v1198_v27 = vpop.f32.mrb[7].mxu0 }
 0x310   :  { %v359_v28 = vsel %vm357_vm5, %v352_v23, %v358_v26 }
 0x311   :  { %v360_v29 = vrot.slane %v359_v28, 4 }
 0x313   :  { %v361_v30 = vadd.f32 %v360_v29, %v359_v28 }
 0x315   :  { %v362_v31 = vrot.slane %v361_v30, 2 }
 0x317   :  { %v363_v32 = vadd.f32 %v362_v31, %v361_v30 }
 0x319   :  { %v364_v33 = vrot.slane %v363_v32, 1 }
 0x31b   :  { %v365_v34 = vadd.f32 %v364_v33, %v363_v32  ;;  %v1291_v32 = vld [vmem:[#allocation2 + $0x88] sm:$0xff]  }
 0x31d   :  { %v366_v35 = vmul.f32 0.125, %v365_v34 }
 0x31f   :  { %v367_v36 = vsub.f32 %v359_v28, %v366_v35 }
 0x321   :  { %v368_v37 = vmul.f32 %v367_v36, %v367_v36 }
 0x323   :  { %v369_v38 = vrot.slane %v368_v37, 4 }
 0x325   :  { %v370_v39 = vadd.f32 %v369_v38, %v368_v37  ;;  %v563_v38 = vpop.permute.xlu1 %562 }
 0x327   :  { %v371_v40 = vrot.slane %v370_v39, 2 }
 0x329   :  { %v372_v41 = vadd.f32 %v371_v40, %v370_v39 }
 0x32b   :  { %v373_v42 = vrot.slane %v372_v41, 1 }
 0x32d   :  { %v374_v43 = vadd.f32 %v373_v42, %v372_v41  ;;  %v1292_v41 = vld [vmem:[#allocation2 + $0x90] sm:$0xff]  }
 0x32f   :  { %v375_v44 = vmul.f32 0.125, %v374_v43 }
 0x331   :  { %v376_v45 = vadd.f32 1e-05, %v375_v44 }
 0x333   :  { %1311 = vrsqrt.f32 %v376_v45 }
 0x33d   :  { %v1312_v46 = vpop.eup %1311 }
 0x33e   :  { %v378_v48 = vmul.f32 %v1312_v46, %v367_v36 }
 0x340   :  { %v384_v50 = vmul.f32 %v1074_v47, %v378_v48 }
 0x342   :  { %v390_v51 = vadd.f32 %v1075_v49, %v384_v50  ;;  %v1293_v50 = vld [vmem:[#allocation2 + $0x98] sm:$0xff]  }
 0x343   :  { %1226 = vmatpush3.bf16.msra.mxu1 %v1293_v50 }
 0x344   :  { %v391_v52 = vpack.c.bf16 %v390_v51, %v390_v51  ;;  %1227 = vmatprep.subr.bf16.mxu1 %v1350_v0  ;;  %v1294_v51 = vld [vmem:[#allocation2 + $0xa0] sm:$0xff]  }
 0x346   :  { %1204 = vmatmul.mubr.msk.bf16.vlgmr.msra.gmra.mrb[8].mxu0 %vm52_vm1, %v391_v52  ;;  %v1088_v52 = vld [vmem:[%s1535_s2 + $0xe] ss:$0 sm:$0xff] }
 0x347   :  { %1209 = vmatprep.mubr.msk.bf16.mxu0 %vm1351_vm0, %v1350_v0  ;;  %1208 = vmatpush3.bf16.msra.mxu0 %v1290_v53 }
 0x348   :  { %1213 = vmatprep.subr.bf16.mxu0 %v1350_v0  ;;  %1228 = vmatpush3.bf16.msra.mxu1 %v1294_v51  ;;  %v1097_v51 = vld [vmem:[%s1535_s2 + $0x12] ss:$0 sm:$0xff] }
 0x349   :  { %1245 = vmatprep.subr.bf16.mxu1 %v1350_v0 }
 0x419   :  { %v450_v55 = vpop.f32.mrb[8].mxu0 }
 0x41a   :  { %v451_v56 = vadd.f32 %v1076_v54, %v450_v55  ;;  %v1205_v57 = vpop.f32.mrb[9].mxu0 }
 0x41b   :  { %v453_v58 = vpop.f32.mrb[10].mxu0 }
 0x41c   :  { %vm456_vm6 = vcmp.gt.f32.partialorder %v451_v56, 0.0  ;;  %v457_v59 = vmul.f32 0.2, %v451_v56  ;;  %v1206_v60 = vpop.f32.mrb[11].mxu0 }
 0x41e   :  { %v458_v61 = vsel %vm456_vm6, %v451_v56, %v457_v59 }
 0x41f   :  { %v459_v62 = vrot.slane %v458_v61, 4 }
 0x421   :  { %v460_v63 = vadd.f32 %v459_v62, %v458_v61 }
 0x423   :  { %v461_v1 = vrot.slane %v460_v63, 2 }
 0x425   :  { %v462_v2 = vadd.f32 %v461_v1, %v460_v63 }
 0x427   :  { %v463_v4 = vrot.slane %v462_v2, 1 }
 0x429   :  { %v464_v5 = vadd.f32 %v463_v4, %v462_v2 }
 0x42b   :  { %v465_v6 = vmul.f32 0.125, %v464_v5 }
 0x42d   :  { %v466_v7 = vsub.f32 %v458_v61, %v465_v6 }
 0x42f   :  { %v467_v8 = vmul.f32 %v466_v7, %v466_v7 }
 0x431   :  { %v468_v9 = vrot.slane %v467_v8, 4 }
 0x433   :  { %v469_v10 = vadd.f32 %v468_v9, %v467_v8 }
 0x435   :  { %v470_v11 = vrot.slane %v469_v10, 2 }
 0x437   :  { %v471_v12 = vadd.f32 %v470_v11, %v469_v10 }
 0x439   :  { %v472_v13 = vrot.slane %v471_v12, 1 }
 0x43b   :  { %v473_v14 = vadd.f32 %v472_v13, %v471_v12 }
 0x43d   :  { %v474_v15 = vmul.f32 0.125, %v473_v14 }
 0x43f   :  { %v475_v16 = vadd.f32 1e-05, %v474_v15 }
 0x441   :  { %1313 = vrsqrt.f32 %v475_v16  ;;  %v1091_v16 = vld [vmem:[%s1535_s2 + $0xf] ss:$0 sm:$0xff] }
 0x44b   :  { %v1314_v17 = vpop.eup %1313 }
 0x44c   :  { %v477_v19 = vmul.f32 %v1314_v17, %v466_v7 }
 0x44e   :  { %v483_v21 = vmul.f32 %v1080_v18, %v477_v19  ;;  %v1092_v18 = vld [vmem:[%s1535_s2 + $0x10] ss:$0 sm:$0xff] }
 0x450   :  { %v489_v22 = vadd.f32 %v1081_v20, %v483_v21 }
 0x452   :  { %v490_v23 = vpack.c.bf16 %v489_v22, %v489_v22  ;;  %v1295_v22 = vld [vmem:[#allocation2 + $0xa8] sm:$0xff]  }
 0x454   :  { %1210 = vmatmul.mubr.msk.bf16.vlgmr.msra.gmra.mrb[12].mxu0 %vm504_vm7, %v490_v23  ;;  %v1296_v23 = vld [vmem:[#allocation2 + $0xb0] sm:$0xff]  }
 0x455   :  { %1215 = vmatprep.mubr.msk.bf16.mxu0 %vm1351_vm0, %v1350_v0  ;;  %1214 = vmatpush3.bf16.msra.mxu0 %v1291_v32 }
 0x456   :  { %1219 = vmatprep.subr.bf16.mxu0 %v1350_v0 }
 0x527   :  { %v542_v25 = vpop.f32.mrb[12].mxu0 }
 0x528   :  { %v543_v26 = vadd.f32 %v1082_v24, %v542_v25  ;;  %v1211_v27 = vpop.f32.mrb[13].mxu0  ;;  %v1297_v24 = vld [vmem:[#allocation2 + $0xb8] sm:$0xff]   ;;  %v1298_v25 = vld [vmem:[#allocation2 + $0xc0] sm:$0xff]  }
 0x529   :  { %v545_v28 = vpop.f32.mrb[14].mxu0 }
 0x52a   :  { %v548_v29 = vmul.f32 0.5, %v543_v26  ;;  %1042 = vrot.lane.b32.xlu1 %v543_v26, %s1353_s26  ;;  %v1212_v30 = vpop.f32.mrb[15].mxu0 }
 0x52c   :  { %v549_v31 = vmul.f32 1.442695, %v548_v29 }
 0x52e   :  { %1315 = vpow2.f32 %v549_v31 }
 0x538   :  { %v1316_v33 = vpop.eup %1315 }
 0x539   :  { %552 = vrot.lane.b32.xlu0 %v1316_v33, %s1354_s27 }
 0x5ab   :  { %v553_v34 = vpop.permute.xlu0 %552 }
 0x5ac   :  { %v555_v35 = vmul.f32 %v553_v34, %v1397_v3  ;;  %v1085_v3 = vld [vmem:[%s1535_s2 + $0xd] ss:$0 sm:$0xff] }
 0x5ae   :  { %557 = vrot.lane.b32.xlu0 %v555_v35, %s1355_s0 }
 0x620   :  { %v558_v36 = vpop.permute.xlu0 %557 }
 0x621   :  { %v560_v37 = vadd.f32 %v558_v36, %v543_v26  ;;  %v1093_v26 = vld [vmem:[%s1535_s2 + $0x11] ss:$0 sm:$0xff] }
 0x623   :  { %v566_v39 = vsel %vm565_vm8, %v560_v37, %v563_v38 }
 0x624   :  { %v568_v40 = vsel %vm567_vm9, %v566_v39, 0.0 }
 0x625   :  { %v569_v42 = vpack.c.bf16 %v568_v40, %v568_v40 }
 0x627   :  { %1216 = vmatmul.mubr.msk.bf16.vlgmr.msra.gmra.mrb[16].mxu0 %vm504_vm7, %v569_v42 }
 0x628   :  { %1220 = vmatpush3.bf16.msra.mxu0 %v1292_v41  ;;  %1221 = vmatprep.mubr.msk.bf16.mxu0 %vm1351_vm0, %v1350_v0 }
 0x629   :  { %1233 = vmatprep.subr.bf16.mxu0 %v1350_v0 }
 0x6fa   :  { %v620_v43 = vpop.f32.mrb[16].mxu0 }
 0x6fb   :  { %v621_v44 = vadd.f32 %v1085_v3, %v620_v43  ;;  %v1217_v45 = vpop.f32.mrb[17].mxu0 }
 0x6fc   :  { %v623_v46 = vpop.f32.mrb[18].mxu0 }
 0x6fd   :  { %v626_v47 = vmax.f32 %v621_v44, 0.0  ;;  %v1218_v48 = vpop.f32.mrb[19].mxu0 }
 0x6ff   :  { %v627_v49 = vpack.c.bf16 %v626_v47, %v626_v47 }
 0x701   :  { %1222 = vmatmul.mubr.msk.bf16.vlgmr.msra.gmra.mrb[20].mxu0 %vm504_vm7, %v627_v49 }
 0x702   :  { %1241 = vmatprep.mubr.msk.bf16.mxu0 %vm1351_vm0, %v1350_v0  ;;  %1234 = vmatpush3.bf16.msra.mxu0 %v1295_v22 }
 0x703   :  { %1235 = vmatprep.subr.bf16.mxu0 %v1350_v0 }
 0x706   :  { %1236 = vmatpush3.bf16.msra.mxu0 %v1296_v23 }
 0x707   :  { %1237 = vmatprep.subr.bf16.mxu0 %v1350_v0 }
 0x70a   :  { %1238 = vmatpush3.bf16.msra.mxu0 %v1297_v24 }
 0x70b   :  { %1239 = vmatprep.subr.bf16.mxu0 %v1350_v0 }
 0x70e   :  { %1240 = vmatpush3.bf16.msra.mxu0 %v1298_v25 }
 0x7d4   :  { %v678_v53 = vpop.f32.mrb[20].mxu0 }
 0x7d5   :  { %v679_v54 = vadd.f32 %v1088_v52, %v678_v53  ;;  %v1223_v55 = vpop.f32.mrb[21].mxu0  ;;  %v1098_v53 = vld [vmem:[%s1535_s2 + $0x13] ss:$0 sm:$0xff] }
 0x7d6   :  { %v681_v56 = vpop.f32.mrb[22].mxu0 }
 0x7d7   :  { %vm684_vm10 = vcmp.gt.f32.partialorder %v679_v54, 0.0  ;;  %v685_v57 = vmul.f32 0.2, %v679_v54  ;;  %v1224_v58 = vpop.f32.mrb[23].mxu0 }
 0x7d8   :  { %v1300_v58 = vld [vmem:[#allocation2 + $0xd0] sm:$0xff]  }
 0x7d9   :  { %v686_v59 = vsel %vm684_vm10, %v679_v54, %v685_v57  ;;  %v1299_v57 = vld [vmem:[#allocation2 + $0xc8] sm:$0xff]  }
 0x7da   :  { %v687_v60 = vrot.slane %v686_v59, 4 }
 0x7dc   :  { %v688_v61 = vadd.f32 %v687_v60, %v686_v59  ;;  %v1302_v60 = vld [vmem:[#allocation2 + $0xe0] sm:$0xff]  }
 0x7de   :  { %v689_v62 = vrot.slane %v688_v61, 2 }
 0x7e0   :  { %v690_v63 = vadd.f32 %v689_v62, %v688_v61  ;;  %v1303_v61 = vld [vmem:[#allocation2 + $0xe8] sm:$0xff]   ;;  %v1304_v62 = vld [vmem:[#allocation2 + $0xf0] sm:$0xff]  }
 0x7e2   :  { %v691_v1 = vrot.slane %v690_v63, 1 }
 0x7e4   :  { %v692_v2 = vadd.f32 %v691_v1, %v690_v63  ;;  %v1305_v63 = vld [vmem:[#allocation2 + $0xf8] sm:$0xff]   ;;  %v1306_v1 = vld [vmem:[#allocation2 + $0x100] sm:$0xff]  }
 0x7e6   :  { %v693_v4 = vmul.f32 0.125, %v692_v2  ;;  %v1099_v2 = vld [vmem:[%s1535_s2 + $0x14] ss:$0 sm:$0xff] }
 0x7e8   :  { %v694_v5 = vsub.f32 %v686_v59, %v693_v4  ;;  %v1301_v59 = vld [vmem:[#allocation2 + $0xd8] sm:$0xff]  }
 0x7ea   :  { %v695_v6 = vmul.f32 %v694_v5, %v694_v5 }
 0x7ec   :  { %v696_v7 = vrot.slane %v695_v6, 4 }
 0x7ee   :  { %v697_v8 = vadd.f32 %v696_v7, %v695_v6 }
 0x7f0   :  { %v698_v9 = vrot.slane %v697_v8, 2 }
 0x7f2   :  { %v699_v10 = vadd.f32 %v698_v9, %v697_v8 }
 0x7f4   :  { %v700_v11 = vrot.slane %v699_v10, 1 }
 0x7f6   :  { %v701_v12 = vadd.f32 %v700_v11, %v699_v10 }
 0x7f8   :  { %v702_v13 = vmul.f32 0.125, %v701_v12 }
 0x7fa   :  { %v703_v14 = vadd.f32 1e-05, %v702_v13 }
 0x7fc   :  { %1317 = vrsqrt.f32 %v703_v14 }
 0x806   :  { %v1318_v15 = vpop.eup %1317 }
 0x807   :  { %v705_v17 = vmul.f32 %v1318_v15, %v694_v5 }
 0x809   :  { %v711_v19 = vmul.f32 %v1091_v16, %v705_v17 }
 0x80b   :  { %v717_v20 = vadd.f32 %v1092_v18, %v711_v19 }
 0x80d   :  { %v718_v21 = vpack.c.bf16 %v717_v20, %v717_v20 }
 0x80f   :  { %1230 = vmatmul.mubr.msk.bf16.vlgmr.msra.gmra.mrb[4].mxu1 %vm52_vm1, %v718_v21 }
 0x810   :  { %1261 = vmatprep.mubr.msk.bf16.mxu1 %vm1351_vm0, %v1350_v0  ;;  %1246 = vmatpush3.bf16.msra.mxu1 %v1299_v57 }
 0x811   :  { %1247 = vmatprep.subr.bf16.mxu1 %v1350_v0 }
 0x814   :  { %1248 = vmatpush3.bf16.msra.mxu1 %v1300_v58 }
 0x815   :  { %1249 = vmatprep.subr.bf16.mxu1 %v1350_v0 }
 0x818   :  { %1250 = vmatpush3.bf16.msra.mxu1 %v1301_v59 }
 0x819   :  { %1251 = vmatprep.subr.bf16.mxu1 %v1350_v0 }
 0x81c   :  { %1252 = vmatpush3.bf16.msra.mxu1 %v1302_v60 }
 0x81d   :  { %1253 = vmatprep.subr.bf16.mxu1 %v1350_v0 }
 0x820   :  { %1254 = vmatpush3.bf16.msra.mxu1 %v1303_v61 }
 0x821   :  { %1255 = vmatprep.subr.bf16.mxu1 %v1350_v0 }
 0x824   :  { %1256 = vmatpush3.bf16.msra.mxu1 %v1304_v62 }
 0x825   :  { %1257 = vmatprep.subr.bf16.mxu1 %v1350_v0 }
 0x828   :  { %1258 = vmatpush3.bf16.msra.mxu1 %v1305_v63 }
 0x829   :  { %1259 = vmatprep.subr.bf16.mxu1 %v1350_v0 }
 0x82c   :  { %1260 = vmatpush3.bf16.msra.mxu1 %v1306_v1 }
 0x8e2   :  { %v777_v27 = vpop.f32.mrb[4].mxu1 }
 0x8e3   :  { %v778_v28 = vadd.f32 %v1093_v26, %v777_v27  ;;  %v1231_v29 = vpop.f32.mrb[5].mxu1 }
 0x8e4   :  { %v780_v30 = vpop.f32.mrb[6].mxu1 }
 0x8e5   :  { %vm783_vm11 = vcmp.gt.f32.partialorder %v778_v28, 0.0  ;;  %v784_v31 = vmul.f32 0.2, %v778_v28  ;;  %v1232_v32 = vpop.f32.mrb[7].mxu1  ;;  %v1106_v30 = vld [vmem:[%s1535_s2 + $0x16] ss:$0 sm:$0xff] }
 0x8e7   :  { %v785_v33 = vsel %vm783_vm11, %v778_v28, %v784_v31  ;;  %v1105_v28 = vld [vmem:[%s1535_s2 + $0x15] ss:$0 sm:$0xff] }
 0x8e8   :  { %v786_v34 = vrot.slane %v785_v33, 4 }
 0x8ea   :  { %v787_v35 = vadd.f32 %v786_v34, %v785_v33  ;;  %v1107_v34 = vld [vmem:[%s1535_s2 + $0x17] ss:$0 sm:$0xff] }
 0x8ec   :  { %v788_v36 = vrot.slane %v787_v35, 2 }
 0x8ee   :  { %v789_v37 = vadd.f32 %v788_v36, %v787_v35 }
 0x8f0   :  { %v790_v38 = vrot.slane %v789_v37, 1 }
 0x8f2   :  { %v791_v39 = vadd.f32 %v790_v38, %v789_v37  ;;  %v1043_v38 = vpop.permute.xlu1 %1042 }
 0x8f4   :  { %v792_v40 = vmul.f32 0.125, %v791_v39 }
 0x8f6   :  { %v793_v41 = vsub.f32 %v785_v33, %v792_v40 }
 0x8f8   :  { %v794_v42 = vmul.f32 %v793_v41, %v793_v41 }
 0x8fa   :  { %v795_v3 = vrot.slane %v794_v42, 4 }
 0x8fc   :  { %v796_v43 = vadd.f32 %v795_v3, %v794_v42 }
 0x8fe   :  { %v797_v44 = vrot.slane %v796_v43, 2 }
 0x900   :  { %v798_v45 = vadd.f32 %v797_v44, %v796_v43 }
 0x902   :  { %v799_v46 = vrot.slane %v798_v45, 1 }
 0x904   :  { %v800_v47 = vadd.f32 %v799_v46, %v798_v45 }
 0x906   :  { %v801_v48 = vmul.f32 0.125, %v800_v47 }
 0x908   :  { %v802_v49 = vadd.f32 1e-05, %v801_v48 }
 0x90a   :  { %1319 = vrsqrt.f32 %v802_v49 }
 0x914   :  { %v1320_v50 = vpop.eup %1319 }
 0x915   :  { %v804_v52 = vmul.f32 %v1320_v50, %v793_v41 }
 0x917   :  { %v810_v54 = vmul.f32 %v1097_v51, %v804_v52 }
 0x919   :  { %v816_v55 = vadd.f32 %v1098_v53, %v810_v54 }
 0x91b   :  { %v817_v56 = vpack.c.bf16 %v816_v55, %v816_v55 }
 0x91d   :  { %1242 = vmatmul.mubr.msk.bf16.vlgmr.msra.gmra.mrb[24].mxu0 %vm313_vm4, %v817_v56 }
 0x9f0   :  { %v892_v4 = vpop.f32.mrb[24].mxu0 }
 0x9f1   :  { %v893_v5 = vadd.f32 %v1099_v2, %v892_v4  ;;  %v1243_v6 = vpop.f32.mrb[25].mxu0 }
 0x9f2   :  { %v895_v7 = vpop.f32.mrb[26].mxu0 }
 0x9f3   :  { %vm898_vm12 = vcmp.gt.f32.partialorder %v893_v5, 0.0  ;;  %v899_v8 = vmul.f32 0.2, %v893_v5  ;;  %v1244_v9 = vpop.f32.mrb[27].mxu0 }
 0x9f5   :  { %v900_v10 = vsel %vm898_vm12, %v893_v5, %v899_v8 }
 0x9f6   :  { %v901_v11 = vrot.slane %v900_v10, 4 }
 0x9f8   :  { %v902_v12 = vadd.f32 %v901_v11, %v900_v10 }
 0x9fa   :  { %v903_v13 = vrot.slane %v902_v12, 2 }
 0x9fc   :  { %v904_v14 = vadd.f32 %v903_v13, %v902_v12 }
 0x9fe   :  { %v905_v15 = vrot.slane %v904_v14, 1 }
 0xa00   :  { %v906_v16 = vadd.f32 %v905_v15, %v904_v14 }
 0xa02   :  { %v907_v0 = vmul.f32 0.125, %v906_v16 }
 0xa04   :  { %v908_v17 = vsub.f32 %v900_v10, %v907_v0 }
 0xa06   :  { %v909_v18 = vmul.f32 %v908_v17, %v908_v17 }
 0xa08   :  { %v910_v19 = vrot.slane %v909_v18, 4 }
 0xa0a   :  { %v911_v20 = vadd.f32 %v910_v19, %v909_v18 }
 0xa0c   :  { %v912_v21 = vrot.slane %v911_v20, 2 }
 0xa0e   :  { %v913_v22 = vadd.f32 %v912_v21, %v911_v20 }
 0xa10   :  { %v914_v23 = vrot.slane %v913_v22, 1 }
 0xa12   :  { %v915_v24 = vadd.f32 %v914_v23, %v913_v22 }
 0xa14   :  { %v916_v25 = vmul.f32 0.125, %v915_v24 }
 0xa16   :  { %v917_v26 = vadd.f32 1e-05, %v916_v25 }
 0xa18   :  { %1321 = vrsqrt.f32 %v917_v26 }
 0xa22   :  { %v1322_v27 = vpop.eup %1321 }
 0xa23   :  { %v919_v29 = vmul.f32 %v1322_v27, %v908_v17 }
 0xa25   :  { %v925_v31 = vmul.f32 %v1105_v28, %v919_v29 }
 0xa27   :  { %v931_v32 = vadd.f32 %v1106_v30, %v925_v31 }
 0xa29   :  { %v932_v33 = vpack.c.bf16 %v931_v32, %v931_v32 }
 0xa2b   :  { %1262 = vmatmul.mubr.bf16.vlgmr.msra.gmra.mrb[8].mxu1 %v932_v33 }
 0xafe   :  { %v1036_v35 = vpop.f32.mrb[8].mxu1 }
 0xaff   :  { %v1037_v36 = vadd.f32 %v1107_v34, %v1036_v35  ;;  %v1263_v37 = vpop.f32.mrb[9].mxu1 }
 0xb00   :  { %v1039_v39 = vpop.f32.mrb[10].mxu1 }
 0xb01   :  { %v1044_v40 = vadd.f32 %v1043_v38, %v1037_v36  ;;  %v1264_v41 = vpop.f32.mrb[11].mxu1 }
 0xb03   :  { %1045 = vst [vmem:[%s1536_s3] sm:$0xff] %v1044_v40 }
 0xb04   :  { %1050 = vsyncpa [#allocation3], 1 }

</bundles_post_ra>
